<compile_context>
chip_gen: v7x
topology: tpu7x:2x2x1
jax: 0.10.0
libtpu: 0.0.40
codegen_flags: <defaults>
</compile_context>

<pallas_src>
import functools
import math

import jax
import jax.numpy as jnp
from jax.experimental import pallas as pl
from jax.experimental.pallas import tpu as pltpu

_BN_EPS = 1e-5
_FOLD_K_MAX = 256      # fold taps into K while K fits one MXU contraction pass
_LANE = 128
_SUBLANE_BF16 = 16     # bf16 packs 16 sublanes per native (16, 128) tile


def _round_up(x, m):
    return (x + m - 1) // m * m


def _conv_taps_kernel(x_ref, w_ref, scale_ref, bias_ref, o_ref, *,
                      tap_offsets, h_out, w_out_p, slope):
    """Sum of per-tap MXU matmuls + folded-BN affine + LeakyReLU.

    x_ref:     (1, R, C, Kc)       bf16 activations, layout built by the wrapper
    w_ref:     (n_taps, Kc, Cout)  bf16 per-tap weight matrices
    scale_ref: (1, Cout) f32       bias_ref: (1, Cout) f32   (folded BatchNorm)
    o_ref:     (1, h_out*w_out_p, Cout)
    """
    kc = x_ref.shape[-1]
    cout = o_ref.shape[-1]
    m = h_out * w_out_p

    acc = jnp.zeros((m, cout), jnp.float32)
    # All slices are static and unit-stride (strided layers were phase- or
    # im2col-decomposed in the wrapper); activations and weights are already
    # bf16 so each tap is a single MXU matmul with f32 accumulation.
    for t, (ro, co) in enumerate(tap_offsets):
        patch = x_ref[0, pl.ds(ro, h_out), pl.ds(co, w_out_p), :]
        acc = acc + jnp.dot(patch.reshape(m, kc), w_ref[t],
                            preferred_element_type=jnp.float32)

    y = acc * scale_ref[...] + bias_ref[...]      # folded BN (or plain bias)
    y = jnp.where(y >= 0.0, y, slope * y)         # LeakyReLU (slope=1 -> id)
    o_ref[0] = y.astype(o_ref.dtype)


def conv_bn_lrelu(x_nhwc, w_oihw, scale, bias, *, stride, padding, slope,
                  out_dtype):
    """One Discriminator layer: Conv2d (+folded BN) (+LeakyReLU). NHWC in/out."""
    B, H, W, Cin = x_nhwc.shape
    Cout, Cin_w, k, k2 = w_oihw.shape
    assert Cin_w == Cin and k == k2
    s, p = stride, padding
    assert k % s == 0, "phase decomposition assumes k % stride == 0"
    h_out = (H + 2 * p - k) // s + 1
    w_out = (W + 2 * p - k) // s + 1
    assert h_out > 0 and w_out > 0
    ka = k // s                                   # taps per phase per spatial dim
    w_out_p = _round_up(w_out, _SUBLANE_BF16)     # sublane-aligned output width

    x_bf = x_nhwc.astype(jnp.bfloat16)
    wt = jnp.transpose(w_oihw, (2, 3, 1, 0)).astype(jnp.bfloat16)  # (k,k,Cin,Cout)

    if k * k * Cin <= _FOLD_K_MAX:
        # --- full wrapper-side im2col: a single (M, k*k*Cin) matmul in-kernel.
        hreq = s * (h_out - 1) + k
        wreq = s * (w_out_p - 1) + k
        x_pad = jnp.pad(x_bf, ((0, 0), (p, max(0, hreq - H - p)),
                               (p, max(0, wreq - W - p)), (0, 0)))
        x_prep = jnp.concatenate(
            [x_pad[:, ky:ky + s * h_out:s, kx:kx + s * w_out_p:s, :]
             for ky in range(k) for kx in range(k)], axis=-1)
        w_taps = wt.reshape(1, k * k * Cin, Cout)
        tap_offsets = ((0, 0),)
    elif s > 1 and ka * ka * Cin <= _FOLD_K_MAX:
        # --- phase-decompose (all in-kernel slices unit-stride) and fold the
        #     ka*ka taps of each phase into K: s*s matmuls with K = ka*ka*Cin.
        hc, wc = h_out + ka - 1, w_out_p + ka - 1
        x_pad = jnp.pad(x_bf, ((0, 0), (p, max(0, s * hc - H - p)),
                               (p, max(0, s * wc - W - p)), (0, 0)))
        groups, w_groups = [], []
        for r in range(s):
            for c in range(s):
                ph = x_pad[:, r:r + s * hc:s, c:c + s * wc:s, :]
                groups.append(jnp.concatenate(
                    [ph[:, ta:ta + h_out, tb:tb + w_out_p, :]
                     for ta in range(ka) for tb in range(ka)], axis=-1))
                w_groups.append(wt[r::s, c::s].reshape(ka * ka * Cin, Cout))
        x_prep = jnp.concatenate(groups, axis=1)
        w_taps = jnp.stack(w_groups, axis=0)
        tap_offsets = tuple((g * h_out, 0) for g in range(s * s))
    else:
        # --- phase-decompose only; one K=Cin matmul per (phase, tap).
        hc, wc = h_out + ka - 1, w_out_p + ka - 1
        x_pad = jnp.pad(x_bf, ((0, 0), (p, max(0, s * hc - H - p)),
                               (p, max(0, s * wc - W - p)), (0, 0)))
        phases = [x_pad[:, r:r + s * hc:s, c:c + s * wc:s, :]
                  for r in range(s) for c in range(s)]
        x_prep = jnp.concatenate(phases, axis=1) if len(phases) > 1 else phases[0]
        w_taps = jnp.stack(
            [wt[ta * s + r, tb * s + c]
             for r in range(s) for c in range(s)
             for ta in range(ka) for tb in range(ka)], axis=0)
        tap_offsets = tuple((g * hc + ta, tb)
                            for g in range(s * s)
                            for ta in range(ka) for tb in range(ka))

    n_taps, kc = int(w_taps.shape[0]), int(w_taps.shape[1])
    _, R, C, _ = x_prep.shape
    m = h_out * w_out_p
    scale2 = scale.reshape(1, Cout).astype(jnp.float32)
    bias2 = bias.reshape(1, Cout).astype(jnp.float32)

    kernel = functools.partial(_conv_taps_kernel, tap_offsets=tap_offsets,
                               h_out=h_out, w_out_p=w_out_p, slope=slope)

    out = pl.pallas_call(
        kernel,
        out_shape=jax.ShapeDtypeStruct((B, m, Cout), out_dtype),
        grid_spec=pltpu.PrefetchScalarGridSpec(
            num_scalar_prefetch=0,
            grid=(B,),
            in_specs=[
                pl.BlockSpec((1, R, C, kc), lambda b: (b, 0, 0, 0)),
                # Constant index_map: weights + affine are fetched once and
                # stay resident in VMEM across the batch grid.
                pl.BlockSpec((n_taps, kc, Cout), lambda b: (0, 0, 0)),
                pl.BlockSpec((1, Cout), lambda b: (0, 0)),
                pl.BlockSpec((1, Cout), lambda b: (0, 0)),
            ],
            out_specs=pl.BlockSpec((1, m, Cout), lambda b: (b, 0, 0)),
        ),
        compiler_params=pltpu.CompilerParams(
            dimension_semantics=("parallel",),
            vmem_limit_bytes=48 * 1024 * 1024,
        ),
    )(x_prep, w_taps, scale2, bias2)

    # Lane-dense (B, M, Cout) slab -> NHWC, dropping width-alignment columns.
    return out.reshape(B, h_out, w_out_p, Cout)[:, :, :w_out, :]


_LAYER_CFGS = (
    dict(cin=4,   cout=64,  k=4, stride=2, padding=1, bn=True),
    dict(cin=64,  cout=128, k=4, stride=2, padding=1, bn=True),
    dict(cin=128, cout=256, k=4, stride=2, padding=1, bn=True),
    dict(cin=256, cout=512, k=4, stride=1, padding=1, bn=True),
    dict(cin=512, cout=1,   k=4, stride=1, padding=1, bn=False),
)


def init_discriminator_params(key):
    params = []
    for cfg in _LAYER_CFGS:
        key, kw, kb, kg, kbe, km, kv = jax.random.split(key, 7)
        fan_in = cfg["cin"] * cfg["k"] * cfg["k"]
        bound = 1.0 / math.sqrt(fan_in)          # torch Conv2d default init bound
        p = dict(cfg)
        p["w"] = jax.random.uniform(
            kw, (cfg["cout"], cfg["cin"], cfg["k"], cfg["k"]),
            jnp.float32, -bound, bound)
        p["b"] = jax.random.uniform(kb, (cfg["cout"],), jnp.float32, -bound, bound)
        if cfg["bn"]:
            p["gamma"] = jax.random.uniform(kg, (cfg["cout"],), jnp.float32, 0.5, 1.5)
            p["beta"] = jax.random.uniform(kbe, (cfg["cout"],), jnp.float32, -0.5, 0.5)
            p["mean"] = jax.random.uniform(km, (cfg["cout"],), jnp.float32, -0.5, 0.5)
            p["var"] = jax.random.uniform(kv, (cfg["cout"],), jnp.float32, 0.5, 1.5)
        params.append(p)
    return params


def discriminator_forward(x_nchw, params):
    """Pallas forward: (B, 4, H, W) NCHW -> (B, 1, H', W') NCHW."""
    x = jnp.transpose(x_nchw.astype(jnp.bfloat16), (0, 2, 3, 1))   # NHWC bf16
    n_layers = len(params)
    for li, p in enumerate(params):
        last = li == n_layers - 1
        if p["bn"]:
            w = p["w"]
            scale = p["gamma"] * jax.lax.rsqrt(p["var"] + _BN_EPS)
            bias = p["beta"] + scale * (p["b"] - p["mean"])
            slope = 0.2
        else:                          # plain Conv2d: bias only, no activation
            w, bias = p["w"], p["b"]
            scale = jnp.ones((p["cout"],), jnp.float32)
            slope = 1.0
            if last and p["cout"] < _LANE:
                # Pad Cout 1 -> 128: lane-dense output stores + a real MXU N
                # dim; the zero channels are sliced off after the layer loop.
                cpad = _LANE - p["cout"]
                w = jnp.pad(w, ((0, cpad), (0, 0), (0, 0), (0, 0)))
                bias = jnp.pad(bias, ((0, cpad),))
                scale = jnp.pad(scale, ((0, cpad),))
        out_dtype = jnp.float32 if last else jnp.bfloat16
        x = conv_bn_lrelu(x, w, scale, bias, stride=p["stride"],
                          padding=p["padding"], slope=slope, out_dtype=out_dtype)
    x = x[..., :params[-1]["cout"]]                 # drop final Cout padding
    return jnp.transpose(x, (0, 3, 1, 2)).astype(jnp.float32)      # NCHW


def _reference(x_nchw, params):
    """Pure-JAX f32 reference (eval-mode BatchNorm) for the numeric check."""
    x = jnp.transpose(x_nchw, (0, 2, 3, 1))
    for p in params:
        w_hwio = jnp.transpose(p["w"], (2, 3, 1, 0))
        y = jax.lax.conv_general_dilated(
            x, w_hwio, window_strides=(p["stride"], p["stride"]),
            padding=[(p["padding"], p["padding"])] * 2,
            dimension_numbers=("NHWC", "HWIO", "NHWC"),
            precision=jax.lax.Precision.HIGHEST)
        y = y + p["b"]
        if p["bn"]:
            y = (y - p["mean"]) * jax.lax.rsqrt(p["var"] + _BN_EPS) * p["gamma"] + p["beta"]
            y = jnp.where(y >= 0.0, y, 0.2 * y)
        x = y
    return jnp.transpose(x, (0, 3, 1, 2))


if __name__ == "__main__":
    key = jax.random.PRNGKey(0)
    kx, kp = jax.random.split(key)

    # Smallest friendly input for this 5-conv stack: 16x16 would shrink to 0x0
    # at the final conv, so use 32x32 (-> 16 -> 8 -> 4 -> 3 -> 2).
    B, C, H, W = 2, 4, 32, 32
    x = jax.random.normal(kx, (B, C, H, W), dtype=jnp.float32)
    params = init_discriminator_params(kp)

    out = discriminator_forward(x, params)
    out = jax.block_until_ready(out)

    ref = _reference(x, params)
    assert out.shape == ref.shape == (B, 1, 2, 2), (out.shape, ref.shape)
    max_err = float(jnp.max(jnp.abs(out - ref)))
    assert bool(jnp.allclose(out, ref, rtol=2e-2, atol=2e-2)), max_err

    print("KERNEL_OK")
</pallas_src>

<mosaic_0001>
module attributes {stable_mosaic.version = 11 : i64} {
  func.func @_conv_taps_kernel(%arg0: i32, %arg1: memref<1x16x16x64xbf16, #tpu.memory_space<vmem>>, %arg2: memref<1x64x64xbf16, #tpu.memory_space<vmem>>, %arg3: memref<1x64xf32, #tpu.memory_space<vmem>>, %arg4: memref<1x64xf32, #tpu.memory_space<vmem>>, %arg5: memref<1x256x64xbf16, #tpu.memory_space<vmem>>) attributes {dimension_semantics = [#tpu.dimension_semantics<parallel>], iteration_bounds = array<i64: 2>, scalar_prefetch = 0 : i64, scratch_operands = 0 : i64, tpu.core_type = #tpu.core_type<tc>, window_params = [{transform_indices = @transform_0, window_bounds = array<i64: 1, 16, 16, 64>}, {pipeline_mode = #tpu.pipeline_mode<synchronous>, transform_indices = @transform_1, window_bounds = array<i64: 1, 64, 64>}, {pipeline_mode = #tpu.pipeline_mode<synchronous>, transform_indices = @transform_2, window_bounds = array<i64: 1, 64>}, {pipeline_mode = #tpu.pipeline_mode<synchronous>, transform_indices = @transform_3, window_bounds = array<i64: 1, 64>}, {transform_indices = @transform_4, window_bounds = array<i64: 1, 256, 64>}]} {
    %cst = arith.constant 0.000000e+00 : f32
    %0 = vector.broadcast %cst : f32 to vector<256x64xf32>
    %c0 = arith.constant 0 : index
    %c0_0 = arith.constant 0 : index
    %c0_1 = arith.constant 0 : index
    %c0_2 = arith.constant 0 : index
    %1 = vector.load %arg1[%c0, %c0_0, %c0_1, %c0_2] : memref<1x16x16x64xbf16, #tpu.memory_space<vmem>>, vector<1x16x16x64xbf16>
    %2 = vector.shape_cast %1 : vector<1x16x16x64xbf16> to vector<16x16x64xbf16>
    %3 = vector.shape_cast %2 : vector<16x16x64xbf16> to vector<256x64xbf16>
    %c0_3 = arith.constant 0 : index
    %c0_4 = arith.constant 0 : index
    %c0_5 = arith.constant 0 : index
    %4 = vector.load %arg2[%c0_3, %c0_4, %c0_5] : memref<1x64x64xbf16, #tpu.memory_space<vmem>>, vector<1x64x64xbf16>
    %5 = vector.shape_cast %4 : vector<1x64x64xbf16> to vector<64x64xbf16>
    %cst_6 = arith.constant dense<0.000000e+00> : vector<256x64xf32>
    %6 = tpu.matmul %3, %5, %cst_6 {dimension_numbers = #tpu.dot_dimension_numbers<[1], [0], [0], [1], [0, 0, 1, 1], [], []>} : vector<256x64xbf16>, vector<64x64xbf16>, vector<256x64xf32> -> vector<256x64xf32>
    %7 = arith.addf %0, %6 : vector<256x64xf32>
    %c0_7 = arith.constant 0 : index
    %c0_8 = arith.constant 0 : index
    %8 = vector.load %arg3[%c0_7, %c0_8] : memref<1x64xf32, #tpu.memory_space<vmem>>, vector<1x64xf32>
    %9 = vector.broadcast %8 : vector<1x64xf32> to vector<256x64xf32>
    %10 = arith.mulf %7, %9 : vector<256x64xf32>
    %c0_9 = arith.constant 0 : index
    %c0_10 = arith.constant 0 : index
    %11 = vector.load %arg4[%c0_9, %c0_10] : memref<1x64xf32, #tpu.memory_space<vmem>>, vector<1x64xf32>
    %12 = vector.broadcast %11 : vector<1x64xf32> to vector<256x64xf32>
    %13 = arith.addf %10, %12 : vector<256x64xf32>
    %cst_11 = arith.constant 0.000000e+00 : f32
    %14 = vector.broadcast %cst_11 : f32 to vector<256x64xf32>
    %15 = arith.cmpf oge, %13, %14 : vector<256x64xf32>
    %cst_12 = arith.constant 2.000000e-01 : f32
    %16 = vector.broadcast %cst_12 : f32 to vector<256x64xf32>
    %17 = arith.mulf %16, %13 : vector<256x64xf32>
    %18 = arith.select %15, %13, %17 : vector<256x64xi1>, vector<256x64xf32>
    %19 = arith.truncf %18 : vector<256x64xf32> to vector<256x64xbf16>
    %c0_13 = arith.constant 0 : index
    %c0_14 = arith.constant 0 : index
    %c0_15 = arith.constant 0 : index
    %20 = vector.load %arg5[%c0_13, %c0_14, %c0_15] : memref<1x256x64xbf16, #tpu.memory_space<vmem>>, vector<1x256x64xbf16>
    %21 = vector.shape_cast %20 : vector<1x256x64xbf16> to vector<256x64xbf16>
    %22 = vector.shape_cast %19 : vector<256x64xbf16> to vector<1x256x64xbf16>
    tpu.vector_store %arg5[%c0_13, %c0_14, %c0_15], %22 {strides = array<i32>} : memref<1x256x64xbf16, #tpu.memory_space<vmem>>, vector<1x256x64xbf16>,
    return
  }
  func.func @transform_0(%arg0: i32) -> (i32, i32, i32, i32) {
    %c0_i32 = arith.constant 0 : i32
    %c0_i32_0 = arith.constant 0 : i32
    %c0_i32_1 = arith.constant 0 : i32
    %c0_i32_2 = arith.constant 0 : i32
    return %arg0, %c0_i32, %c0_i32_0, %c0_i32_1 : i32, i32, i32, i32
  }
  func.func @transform_1(%arg0: i32) -> (i32, i32, i32) {
    %c0_i32 = arith.constant 0 : i32
    %c0_i32_0 = arith.constant 0 : i32
    %c0_i32_1 = arith.constant 0 : i32
    %c0_i32_2 = arith.constant 0 : i32
    return %c0_i32, %c0_i32_0, %c0_i32_1 : i32, i32, i32
  }
  func.func @transform_2(%arg0: i32) -> (i32, i32) {
    %c0_i32 = arith.constant 0 : i32
    %c0_i32_0 = arith.constant 0 : i32
    %c0_i32_1 = arith.constant 0 : i32
    return %c0_i32, %c0_i32_0 : i32, i32
  }
  func.func @transform_3(%arg0: i32) -> (i32, i32) {
    %c0_i32 = arith.constant 0 : i32
    %c0_i32_0 = arith.constant 0 : i32
    %c0_i32_1 = arith.constant 0 : i32
    return %c0_i32, %c0_i32_0 : i32, i32
  }
  func.func @transform_4(%arg0: i32) -> (i32, i32, i32) {
    %c0_i32 = arith.constant 0 : i32
    %c0_i32_0 = arith.constant 0 : i32
    %c0_i32_1 = arith.constant 0 : i32
    return %arg0, %c0_i32, %c0_i32_0 : i32, i32, i32
  }
}

</mosaic_0001>

<bundles_post_ra>
// kernel: tpu_custom_call.1
= control target key start
LH: loop header
LB: loop body
LE: loop exit
PB: predicated region body
PF: predicated region fallthrough
CT: control target
= control target key end

     0   :  { %9 = vsyncpa [#allocation3], 0  ;;  %s1737_s0 = inlined_call_operand.hbm [shape: bf16[2,16,16,64], index: 0, kind: input, shape index: {}]   ;;  %s1738_s1 = inlined_call_operand.hbm [shape: bf16[1,64,64], index: 1, kind: input, shape index: {}]   ;;  %s1739_s2 = inlined_call_operand.vmem [shape: f32[1,64], index: 2, kind: input, shape index: {}]   ;;  %s1740_s3 = inlined_call_operand.vmem [shape: f32[1,64], index: 3, kind: input, shape index: {}]   ;;  %s1741_s4 = inlined_call_operand.vmem [shape: bf16[2,256,64], index: 4, kind: output, shape index: {}]  }
   0x1   :  { %11 = vsyncpa [#allocation3 + $0x1], 0 }
   0x2   :  { %12 = vsyncpa [#allocation5], 0  ;;  %s1385_s15 = smov 0   ;;  %s1387_s16 = smov 0  }
   0x3   :  { %s1389_s17 = smov 0   ;;  %s1391_s18 = smov 0  }
   0x4 LB: > { %s1404_s19 = sadd.s32 4294967295, %s1354_s18   ;;  %p38_p0 = scmp.ne.s32.totalorder %s1346_s16, %s1342_s15  ;;  %s1354_s18 = sphi %s1391_s18, %s1756_s18   ;;  %s1350_s17 = sphi %s1389_s17, %s1755_s17   ;;  %s1346_s16 = sphi %s1387_s16, %s1754_s16   ;;  %s1342_s15 = sphi %s1385_s15, %s1753_s15  }
   0x5   : > { %p1742_p1 = scmp.eq.s32.totalorder %s1404_s19, 0  ;;  %p1001_p2 = scmp.ge.s32.totalorder %s1354_s18, 1 }
   0x6   : > { %p138_p3 = scmp.lt.s32.totalorder %s1354_s18, 3  ;;  %s1356_s22 = smov [#allocation4]  }
   0x7   : > { %p1412_p4 = por %p1742_p1, %p38_p0  ;;  %s150_s23 = sshll.u32 %s1356_s22, 4  ;;  %s151_s23 = int_to_ptr.vmem [resolvable:$true] %s150_s23 }
   0x8   : > { %p1416_p5 = pnand %p1001_p2, %p138_p3  ;;  %s1429_s25 = sadd.s32 1, %s1354_s18  }
   0x9   : > { %s1745_s20 = scalar_select %p1412_p4, 1, 0 }
   0xa   : > { %s1746_s21 = scalar_select %p1416_p5, 1, 0 }
   0xb   : > { %p1192_p6 = pneg %p1416_p5  ;;  %s25_s26 = sadd.s32 1, %s1350_s17 }
   0xc   : > { %s22_s27 = ssub.s32 %s1354_s18, %s1429_s25  ;;  %s1258_s30 = scalar_lea.hbm %s1738_s1, 512 }
   0xd   : > { %p1424_p7 = pnand %p1192_p6, %p1742_p1  ;;  %p1259_p8 = scmp.ne.s32.totalorder %s1738_s1, %s1258_s30 }
   0xe   : > { %p1265_p12 = scmp.lt.u32.totalorder %s1258_s30, %s1738_s1 }
   0xf   : > { %p1260_p9 = pneg %p1424_p7 }
  0x11   : > { %p1261_p10 = pnand %p1260_p9, %p1259_p8 }
  0x13   : > { %p1262_p11 = pneg %p1261_p10 }
  0x15   : > { %p1267_p13 = pnand %p1265_p12, %p1262_p11 }
  0x17   : > { %1270 = shalt.err (!%p1267_p13)
}
  0x18   : > { %s1271_s9 = scalar_lea.vmem %s151_s23, 512  ;;  %p1279_p6 = scmp.lt.s32.totalorder %s151_s23, %s151_s23 }
  0x19   : > { %p1272_p0 = scmp.ne.s32.totalorder %s151_s23, %s1271_s9  ;;  %p1280_p1 = scmp.lt.s32.totalorder %s1271_s9, %s1271_s9 }
  0x1b   : > { %p1274_p2 = pnand %p1272_p0, %p1260_p9  ;;  %p1281_p4 = por %p1280_p1, %p1279_p6 }
  0x1d   : > { %p1275_p3 = pneg %p1274_p2 }
  0x1f   : > { %p1282_p5 = pnand %p1281_p4, %p1275_p3 }
  0x21   : > { %1285 = shalt.err (!%p1282_p5)
}
  0x22   : > { %s1357_s10 = smov 64   ;;  %s1358_s11 = smov 4  }
  0x23   : > { %1195 = dma.hbm_to_vmem [thread:$0]  (!%p1424_p7), %s1738_s1, 512, %s151_s23, [#allocation5], %s1357_s10, %s1357_s10, %s1358_s11  }
  0x24   : > { %p23_p1 = scmp.eq.s32.totalorder %s22_s27, 0  ;;  %p32_p4 = scmp.ne.s32.totalorder %s1350_s17, %s1346_s16 }
  0x25   : > { %p33_p5 = scmp.eq.s32.totalorder %s1354_s18, 0  ;;  %p1201_p8 = scmp.lt.s32.totalorder %s1354_s18, 2 }
  0x26   : > { %s1458_s14 = scalar_select %p23_p1, %s1350_s17, %s25_s26  }
  0x27   : > { %p34_p9 = por %p33_p5, %p32_p4  ;;  %s170_s15 = sand.u32 1, %s1350_s17  }
  0x28   : > { %s1004_s22 = sshll.u32 %s170_s15, 7  ;;  %s1084_s28 = sshll.u32 %s1354_s18, 11 }
  0x29   : > { %s1465_s24 = scalar_lea.hbm %s1737_s0, %s1084_s28  ;;  %s174_s23 = scalar_lea.vmem [#allocation2], %s1004_s22 }
  0x2a   : > { %s181_s27 = sshll.u32 %s174_s23, 4  ;;  %p1469_p7 = pnand %p1201_p8, %p34_p9  ;;  %s1467_s27 = int_to_ptr.vmem [resolvable:$true] %s181_s27 }
  0x2b   : > { %s1473_s18 = scalar_lea.sflag [#allocation3], %s170_s15  ;;  %s1286_s5 = scalar_lea.hbm %s1465_s24, 2048 }
  0x2c   : > { %p1287_p10 = scmp.ne.s32.totalorder %s1465_s24, %s1286_s5  ;;  %p1288_p11 = pneg %p1469_p7 }
  0x2d   : > { %s1291_s8 = scalar_lea.hbm %s1737_s0, 4096  ;;  %p1292_p0 = scmp.lt.u32.totalorder %s1465_s24, %s1737_s0 }
  0x2e   : > { %p1289_p12 = pnand %p1288_p11, %p1287_p10  ;;  %p1293_p2 = scmp.lt.u32.totalorder %s1291_s8, %s1286_s5 }
  0x2f   : > { %p1295_p6 = scmp.lt.u32.totalorder %s1286_s5, %s1465_s24 }
  0x30   : > { %p1290_p13 = pneg %p1289_p12  ;;  %p1294_p3 = por %p1293_p2, %p1292_p0 }
  0x32   : > { %p1296_p1 = por %p1295_p6, %p1294_p3 }
  0x34   : > { %p1297_p4 = pnand %p1296_p1, %p1290_p13 }
  0x36   : > { %1300 = shalt.err (!%p1297_p4)
}
  0x37   : > { %s1301_s13 = scalar_lea.vmem %s1467_s27, 2048  ;;  %s1359_s15 = smov [#allocation2]  }
  0x38   : > { %p1302_p5 = scmp.ne.s32.totalorder %s1467_s27, %s1301_s13  ;;  %s1306_s22 = sshll.u32 %s1359_s15, 4  ;;  %s1307_s22 = int_to_ptr.vmem [resolvable:$false] %s1306_s22 }
  0x39   : > { %s1308_s28 = scalar_lea.vmem %s1307_s22, 4096  ;;  %p1309_p10 = scmp.lt.s32.totalorder %s1467_s27, %s1307_s22 }
  0x3a   : > { %p1304_p8 = pnand %p1302_p5, %p1288_p11  ;;  %p1310_p12 = scmp.lt.s32.totalorder %s1308_s28, %s1301_s13 }
  0x3c   : > { %p1305_p9 = pneg %p1304_p8  ;;  %p1311_p0 = por %p1310_p12, %p1309_p10 }
  0x3e   : > { %p1312_p2 = pnand %p1311_p0, %p1305_p9 }
  0x40   : > { %1315 = shalt.err (!%p1312_p2)
}
  0x41   : > { %1199 = dma.hbm_to_vmem [thread:$0]  (!%p1469_p7), %s1465_s24, 2048, %s1467_s27, %s1473_s18, %s1357_s10, %s1357_s10, %s1358_s11  }
  0x42   : > { %p1749_p11 = scmp.ne.s32.totalorder %s1746_s21, 0 }
  0x43   : > { %s195_s29 = sand.u32 (!%p1749_p11), 1, %s1346_s16   ;;  %p1750_p13 = scmp.ne.s32.totalorder (!%p1749_p11), %s1745_s20, 0 }
  0x44   : > { %193 = sbr.rel (%p1749_p11) target bundleno = 362 (0x16a), region = 36  ;;  %s1008_s30 = sshll.u32 (!%p1749_p11), %s195_s29, 7 }
  0x45   : > { %s196_s23 = scalar_lea.sflag (!%p1749_p11), [#allocation3], %s195_s29  ;;  %s1507_s5 = scalar_lea.vmem (!%p1749_p11), [#allocation2], %s1008_s30 }
  0x4b   : > { %1333 = dma.done.wait (%p1750_p13), %s196_s23, 2048  }
  0x4c   : > { %1335 = vsyncadd (%p1750_p13), %s196_s23, 4294965248  ;;  %p1751_p3 = scmp.eq.s32.totalorder %s1404_s19, 0 }
  0x4e   : > { %1337 = dma.done.wait (%p1751_p3), [#allocation5], 512   ;;  %p1752_p7 = pmov %p1751_p3 }
  0x4f   : > { %v1238_v0 = vld [vmem:[#allocation4] sm:$0xff]   ;;  %v1239_v1 = vld [vmem:[#allocation4 + $0x8] sm:$0xff]   ;;  %v1240_v2 = vld [vmem:[#allocation4 + $0x10] sm:$0xff]   ;;  %vm378_vm0 = vcmask 523264   ;;  %p228_p6 = scmp.lt.s32.totalorder %s1404_s19, 1  ;;  %vm890_vm1 = vcmask 519168  }
  0x50   : > { %1339 = vsyncadd (%p1752_p7), [#allocation5], 4294966784  ;;  %1138 = vmatprep.subr.bf16.mxu0 %v1238_v0  ;;  %1178 = vmatprep.subr.bf16.mxu1 %v1238_v0  ;;  %v1242_v3 = vld [vmem:[%s1507_s5] sm:$0xff]   ;;  %v1241_v5 = vld [vmem:[#allocation4 + $0x18] sm:$0xff]  }
  0x51   : > { %1139 = vmatpush3.bf16.msra.mxu0 %v1238_v0  ;;  %1182 = vmatpush3.bf16.msra.mxu1 %v1238_v0  ;;  %v1243_v4 = vld [vmem:[%s1507_s5 + $0x40] sm:$0xff]   ;;  %v1244_v6 = vld [vmem:[%s1507_s5 + $0x8] sm:$0xff]   ;;  %v1246_v8 = vld [vmem:[%s1507_s5 + $0x10] sm:$0xff]   ;;  %s1758_s19 = smov (!%p228_p6, %s1404_s19), 1 }
  0x52   : > { %1140 = vmatprep.subr.bf16.mxu0 %v1239_v1  ;;  %1179 = vmatprep.subr.bf16.mxu1 %v1239_v1  ;;  %v1245_v7 = vld [vmem:[%s1507_s5 + $0x48] sm:$0xff]   ;;  %v1247_v9 = vld [vmem:[%s1507_s5 + $0x50] sm:$0xff]   ;;  %v1248_v10 = vld [vmem:[%s1507_s5 + $0x18] sm:$0xff]   ;;  %s1085_s24 = sshll.u32 %s1758_s19, 7 }
  0x53   : > { %1146 = vmatprep.mubr.msk.bf16.mxu0 %vm378_vm0, %v1242_v3  ;;  %1162 = vmatprep.mubr.msk.bf16.mxu1 %vm378_vm0, %v1243_v4  ;;  %v1249_v11 = vld [vmem:[%s1507_s5 + $0x58] sm:$0xff]   ;;  %v1250_v12 = vld [vmem:[%s1507_s5 + $0x20] sm:$0xff]   ;;  %v1252_v14 = vld [vmem:[%s1507_s5 + $0x28] sm:$0xff]   ;;  %s1579_s19 = scalar_lea.vmem %s1741_s4, %s1085_s24 }
  0x54   : > { %v1251_v13 = vld [vmem:[%s1507_s5 + $0x60] sm:$0xff]   ;;  %v1253_v15 = vld [vmem:[%s1507_s5 + $0x68] sm:$0xff]   ;;  %v1254_v16 = vld [vmem:[%s1507_s5 + $0x30] sm:$0xff]  }
  0x55   : > { %1141 = vmatpush3.bf16.msra.mxu0 %v1239_v1  ;;  %1183 = vmatpush3.bf16.msra.mxu1 %v1239_v1  ;;  %v1255_v17 = vld [vmem:[%s1507_s5 + $0x70] sm:$0xff]   ;;  %v1256_v18 = vld [vmem:[%s1507_s5 + $0x38] sm:$0xff]   ;;  %v1553_v20 = vld [vmem:[%s1739_s2] ss:$0 sm:$0xff] }
  0x56   : > { %1142 = vmatprep.subr.bf16.mxu0 %v1240_v2  ;;  %1180 = vmatprep.subr.bf16.mxu1 %v1240_v2  ;;  %v1257_v19 = vld [vmem:[%s1507_s5 + $0x78] sm:$0xff]   ;;  %v1561_v22 = vld [vmem:[%s1740_s3] ss:$0 sm:$0xff] }
  0x59   : > { %1143 = vmatpush3.bf16.msra.mxu0 %v1240_v2  ;;  %1184 = vmatpush3.bf16.msra.mxu1 %v1240_v2 }
  0x5a   : > { %1144 = vmatprep.subr.bf16.mxu0 %v1241_v5  ;;  %1181 = vmatprep.subr.bf16.mxu1 %v1241_v5 }
  0x5d   : > { %1145 = vmatpush3.bf16.msra.mxu0 %v1241_v5  ;;  %1185 = vmatpush3.bf16.msra.mxu1 %v1241_v5 }
  0x60   : > { %1147 = vmatmul.mubr.msk.bf16.vlgmr.msra.gmra.mrb[0].mxu0 %vm378_vm0, %v1244_v6  ;;  %1163 = vmatmul.mubr.msk.bf16.vlgmr.msra.gmra.mrb[0].mxu1 %vm378_vm0, %v1245_v7 }
  0x61   : > { %1150 = vmatprep.mubr.msk.bf16.mxu0 %vm378_vm0, %v1246_v8  ;;  %1166 = vmatprep.mubr.msk.bf16.mxu1 %vm378_vm0, %v1247_v9 }
  0x68   : > { %1151 = vmatmul.mubr.msk.bf16.gmra.mrb[4].mxu0 %vm378_vm0, %v1248_v10  ;;  %1167 = vmatmul.mubr.msk.bf16.gmra.mrb[4].mxu1 %vm378_vm0, %v1249_v11 }
  0x69   : > { %1154 = vmatprep.mubr.msk.bf16.mxu0 %vm378_vm0, %v1250_v12  ;;  %1170 = vmatprep.mubr.msk.bf16.mxu1 %vm378_vm0, %v1251_v13 }
  0x70   : > { %1155 = vmatmul.mubr.msk.bf16.gmra.mrb[8].mxu0 %vm378_vm0, %v1252_v14  ;;  %1171 = vmatmul.mubr.msk.bf16.gmra.mrb[8].mxu1 %vm378_vm0, %v1253_v15 }
  0x71   : > { %1158 = vmatprep.mubr.msk.bf16.mxu0 %vm378_vm0, %v1254_v16  ;;  %1174 = vmatprep.mubr.msk.bf16.mxu1 %vm378_vm0, %v1255_v17 }
  0x78   : > { %1159 = vmatmul.mubr.msk.bf16.gmra.mrb[12].mxu0 %vm378_vm0, %v1256_v18  ;;  %1175 = vmatmul.mubr.msk.bf16.gmra.mrb[12].mxu1 %vm378_vm0, %v1257_v19 }
 0x133   : > { %v1148_v21 = vpop.f32.mrb[0].mxu0  ;;  %v1164_v23 = vpop.f32.mrb[0].mxu1 }
 0x134   : > { %v597_v24 = vmul.f32 %v1148_v21, %v1553_v20  ;;  %v613_v25 = vmul.f32 %v1164_v23, %v1553_v20  ;;  %v461_v26 = vpop.f32.mrb[1].mxu0  ;;  %v525_v27 = vpop.f32.mrb[1].mxu1 }
 0x135   : > { %v595_v28 = vmul.f32 %v1553_v20, %v461_v26  ;;  %v611_v29 = vmul.f32 %v1553_v20, %v525_v27  ;;  %v1149_v30 = vpop.f32.mrb[2].mxu0  ;;  %v1165_v31 = vpop.f32.mrb[2].mxu1 }
 0x136   : > { %v636_v32 = vadd.f32 %v1561_v22, %v597_v24  ;;  %v652_v33 = vadd.f32 %v1561_v22, %v613_v25  ;;  %v598_v34 = vmul.f32 %v1149_v30, %v1553_v20  ;;  %v614_v35 = vmul.f32 %v1165_v31, %v1553_v20  ;;  %v464_v36 = vpop.f32.mrb[3].mxu0  ;;  %v528_v37 = vpop.f32.mrb[3].mxu1 }
 0x137   : > { %v634_v38 = vadd.f32 %v1561_v22, %v595_v28  ;;  %v650_v39 = vadd.f32 %v1561_v22, %v611_v29  ;;  %v596_v40 = vmul.f32 %v1553_v20, %v464_v36  ;;  %v612_v41 = vmul.f32 %v1553_v20, %v528_v37 }
 0x138   : > { %vm668_vm2 = vcmp.ge.f32.partialorder %v636_v32, 0.0  ;;  %v700_v42 = vmul.f32 0.2, %v636_v32  ;;  %vm684_vm3 = vcmp.ge.f32.partialorder %v652_v33, 0.0  ;;  %v716_v43 = vmul.f32 0.2, %v652_v33 }
 0x139   : > { %vm666_vm4 = vcmp.ge.f32.partialorder %v634_v38, 0.0  ;;  %v698_v44 = vmul.f32 0.2, %v634_v38  ;;  %vm682_vm5 = vcmp.ge.f32.partialorder %v650_v39, 0.0  ;;  %v714_v45 = vmul.f32 0.2, %v650_v39 }
 0x13a   : > { %v732_v46 = vsel %vm668_vm2, %v636_v32, %v700_v42  ;;  %v748_v47 = vsel %vm684_vm3, %v652_v33, %v716_v43  ;;  %v637_v48 = vadd.f32 %v1561_v22, %v598_v34  ;;  %v653_v49 = vadd.f32 %v1561_v22, %v614_v35 }
 0x13b   : > { %v1088_v50 = vpack.c.bf16 %v732_v46, %v732_v46  ;;  %v1104_v51 = vpack.c.bf16 %v748_v47, %v748_v47  ;;  %v730_v52 = vsel %vm666_vm4, %v634_v38, %v698_v44  ;;  %v746_v53 = vsel %vm682_vm5, %v650_v39, %v714_v45  ;;  %v1152_v54 = vpop.f32.mrb[4].mxu0  ;;  %v1168_v55 = vpop.f32.mrb[4].mxu1 }
 0x13c   : > { %v1086_v56 = vpack.c.bf16 %v730_v52, %v730_v52  ;;  %v1102_v57 = vpack.c.bf16 %v746_v53, %v746_v53  ;;  %vm669_vm6 = vcmp.ge.f32.partialorder %v637_v48, 0.0  ;;  %v701_v58 = vmul.f32 0.2, %v637_v48  ;;  %v477_v59 = vpop.f32.mrb[5].mxu0  ;;  %v541_v60 = vpop.f32.mrb[5].mxu1 }
 0x13d   : > { %893 = vst.msk [vmem:[%s1579_s19 + $0x8] sm:$0xf] %vm890_vm1, %v1088_v50  ;;  %909 = vst.msk [vmem:[%s1579_s19 + $0x48] sm:$0xf] %vm890_vm1, %v1104_v51  ;;  %vm685_vm7 = vcmp.ge.f32.partialorder %v653_v49, 0.0  ;;  %v635_v62 = vadd.f32 %v1561_v22, %v596_v40  ;;  %v651_v63 = vadd.f32 %v1561_v22, %v612_v41  ;;  %v1153_v0 = vpop.f32.mrb[6].mxu0  ;;  %v601_v3 = vmul.f32 %v1152_v54, %v1553_v20 }
 0x13e   : > { %v717_v61 = vmul.f32 0.2, %v653_v49  ;;  %v1169_v1 = vpop.f32.mrb[6].mxu1  ;;  %891 = vst.msk [vmem:[%s1579_s19] sm:$0xf] %vm890_vm1, %v1086_v56  ;;  %v733_v2 = vsel %vm669_vm6, %v637_v48, %v701_v58  ;;  %v617_v4 = vmul.f32 %v1168_v55, %v1553_v20  ;;  %v599_v5 = vmul.f32 %v1553_v20, %v477_v59  ;;  %v480_v6 = vpop.f32.mrb[7].mxu0 }
 0x13f   : > { %907 = vst.msk [vmem:[%s1579_s19 + $0x40] sm:$0xf] %vm890_vm1, %v1102_v57  ;;  %v544_v7 = vpop.f32.mrb[7].mxu1  ;;  %v1089_v8 = vpack.c.bf16 %v733_v2, %v733_v2  ;;  %vm667_vm8 = vcmp.ge.f32.partialorder %v635_v62, 0.0  ;;  %v699_v10 = vmul.f32 0.2, %v635_v62  ;;  %v640_v13 = vadd.f32 %v1561_v22, %v601_v3 }
 0x140   : > { %v749_v9 = vsel %vm685_vm7, %v653_v49, %v717_v61  ;;  %vm683_vm9 = vcmp.ge.f32.partialorder %v651_v63, 0.0  ;;  %v715_v12 = vmul.f32 0.2, %v651_v63  ;;  %v656_v15 = vadd.f32 %v1561_v22, %v617_v4 }
 0x141   : > { %v1105_v11 = vpack.c.bf16 %v749_v9, %v749_v9  ;;  %894 = vst.msk [vmem:[%s1579_s19 + $0xc] sm:$0xf] %vm890_vm1, %v1089_v8  ;;  %v731_v14 = vsel %vm667_vm8, %v635_v62, %v699_v10  ;;  %v638_v16 = vadd.f32 %v1561_v22, %v599_v5  ;;  %v615_v17 = vmul.f32 %v1553_v20, %v541_v60 }
 0x142   : > { %v1087_v18 = vpack.c.bf16 %v731_v14, %v731_v14  ;;  %v747_v19 = vsel %vm683_vm9, %v651_v63, %v715_v12  ;;  %vm672_vm10 = vcmp.ge.f32.partialorder %v640_v13, 0.0  ;;  %v704_v21 = vmul.f32 0.2, %v640_v13 }
 0x143   : > { %910 = vst.msk [vmem:[%s1579_s19 + $0x4c] sm:$0xf] %vm890_vm1, %v1105_v11  ;;  %v1103_v23 = vpack.c.bf16 %v747_v19, %v747_v19  ;;  %vm688_vm11 = vcmp.ge.f32.partialorder %v656_v15, 0.0  ;;  %v720_v24 = vmul.f32 0.2, %v656_v15  ;;  %vm670_vm12 = vcmp.ge.f32.partialorder %v638_v16, 0.0 }
 0x144   : > { %v1156_v25 = vpop.f32.mrb[8].mxu0  ;;  %v1172_v26 = vpop.f32.mrb[8].mxu1  ;;  %892 = vst.msk [vmem:[%s1579_s19 + $0x4] sm:$0xf] %vm890_vm1, %v1087_v18  ;;  %v736_v27 = vsel %vm672_vm10, %v640_v13, %v704_v21  ;;  %v702_v28 = vmul.f32 0.2, %v638_v16  ;;  %v654_v29 = vadd.f32 %v1561_v22, %v615_v17  ;;  %v602_v30 = vmul.f32 %v1153_v0, %v1553_v20 }
 0x145   : > { %v493_v31 = vpop.f32.mrb[9].mxu0  ;;  %v557_v32 = vpop.f32.mrb[9].mxu1  ;;  %908 = vst.msk [vmem:[%s1579_s19 + $0x44] sm:$0xf] %vm890_vm1, %v1103_v23  ;;  %v1092_v33 = vpack.c.bf16 %v736_v27, %v736_v27  ;;  %v752_v34 = vsel %vm688_vm11, %v656_v15, %v720_v24  ;;  %v618_v35 = vmul.f32 %v1169_v1, %v1553_v20  ;;  %v600_v36 = vmul.f32 %v1553_v20, %v480_v6 }
 0x146   : > { %v1157_v37 = vpop.f32.mrb[10].mxu0  ;;  %v1173_v38 = vpop.f32.mrb[10].mxu1  ;;  %v1108_v39 = vpack.c.bf16 %v752_v34, %v752_v34  ;;  %v734_v40 = vsel %vm670_vm12, %v638_v16, %v702_v28  ;;  %vm686_vm13 = vcmp.ge.f32.partialorder %v654_v29, 0.0  ;;  %v718_v41 = vmul.f32 0.2, %v654_v29 }
 0x147   : > { %v1613_v42 = vpop.f32.mrb[11].mxu0  ;;  %v1615_v43 = vpop.f32.mrb[11].mxu1  ;;  %897 = vst.msk [vmem:[%s1579_s19 + $0x18] sm:$0xf] %vm890_vm1, %v1092_v33  ;;  %v1090_v44 = vpack.c.bf16 %v734_v40, %v734_v40  ;;  %v641_v45 = vadd.f32 %v1561_v22, %v602_v30  ;;  %v657_v46 = vadd.f32 %v1561_v22, %v618_v35  ;;  %v639_v47 = vadd.f32 %v1561_v22, %v600_v36 }
 0x148   : > { %913 = vst.msk [vmem:[%s1579_s19 + $0x58] sm:$0xf] %vm890_vm1, %v1108_v39  ;;  %v750_v48 = vsel %vm686_vm13, %v654_v29, %v718_v41  ;;  %v616_v49 = vmul.f32 %v1553_v20, %v544_v7  ;;  %v605_v50 = vmul.f32 %v1156_v25, %v1553_v20  ;;  %v621_v51 = vmul.f32 %v1172_v26, %v1553_v20 }
 0x149   : > { %895 = vst.msk [vmem:[%s1579_s19 + $0x10] sm:$0xf] %vm890_vm1, %v1090_v44  ;;  %v1106_v52 = vpack.c.bf16 %v750_v48, %v750_v48  ;;  %vm673_vm14 = vcmp.ge.f32.partialorder %v641_v45, 0.0  ;;  %v705_v53 = vmul.f32 0.2, %v641_v45  ;;  %vm689_vm15 = vcmp.ge.f32.partialorder %v657_v46, 0.0 }
 0x14a   : > { %v721_v54 = vmul.f32 0.2, %v657_v46  ;;  %vm671_vm0 = vcmp.ge.f32.partialorder %v639_v47, 0.0  ;;  %v703_v55 = vmul.f32 0.2, %v639_v47  ;;  %v655_v56 = vadd.f32 %v1561_v22, %v616_v49 }
 0x14b   : > { %911 = vst.msk [vmem:[%s1579_s19 + $0x50] sm:$0xf] %vm890_vm1, %v1106_v52  ;;  %v737_v57 = vsel %vm673_vm14, %v641_v45, %v705_v53  ;;  %v644_v58 = vadd.f32 %v1561_v22, %v605_v50  ;;  %v660_v59 = vadd.f32 %v1561_v22, %v621_v51  ;;  %v603_v60 = vmul.f32 %v1553_v20, %v493_v31  ;;  %v1160_v61 = vpop.f32.mrb[12].mxu0  ;;  %v1176_v62 = vpop.f32.mrb[12].mxu1 }
 0x14c   : > { %v1093_v63 = vpack.c.bf16 %v737_v57, %v737_v57  ;;  %v753_v0 = vsel %vm689_vm15, %v657_v46, %v721_v54  ;;  %v735_v1 = vsel %vm671_vm0, %v639_v47, %v703_v55  ;;  %vm687_vm2 = vcmp.ge.f32.partialorder %v655_v56, 0.0  ;;  %v1635_v2 = vpop.f32.mrb[13].mxu0  ;;  %v1637_v3 = vpop.f32.mrb[13].mxu1 }
 0x14d   : > { %v1109_v4 = vpack.c.bf16 %v753_v0, %v753_v0  ;;  %v1091_v5 = vpack.c.bf16 %v735_v1, %v735_v1  ;;  %v719_v6 = vmul.f32 0.2, %v655_v56  ;;  %vm676_vm3 = vcmp.ge.f32.partialorder %v644_v58, 0.0  ;;  %v1639_v7 = vpop.f32.mrb[14].mxu0  ;;  %v1641_v8 = vpop.f32.mrb[14].mxu1 }
 0x14e   : > { %898 = vst.msk [vmem:[%s1579_s19 + $0x1c] sm:$0xf] %vm890_vm1, %v1093_v63  ;;  %v708_v9 = vmul.f32 0.2, %v644_v58  ;;  %vm692_vm4 = vcmp.ge.f32.partialorder %v660_v59, 0.0  ;;  %v642_v11 = vadd.f32 %v1561_v22, %v603_v60  ;;  %v1646_v12 = vpop.f32.mrb[15].mxu0  ;;  %v619_v14 = vmul.f32 %v1553_v20, %v557_v32 }
 0x14f   : > { %v724_v10 = vmul.f32 0.2, %v660_v59  ;;  %914 = vst.msk [vmem:[%s1579_s19 + $0x5c] sm:$0xf] %vm890_vm1, %v1109_v4  ;;  %896 = vst.msk [vmem:[%s1579_s19 + $0x14] sm:$0xf] %vm890_vm1, %v1091_v5  ;;  %v751_v13 = vsel %vm687_vm2, %v655_v56, %v719_v6  ;;  %v606_v15 = vmul.f32 %v1157_v37, %v1553_v20  ;;  %v622_v16 = vmul.f32 %v1173_v38, %v1553_v20 }
 0x150   : > { %v1656_v17 = vpop.f32.mrb[15].mxu1  ;;  %v1107_v18 = vpack.c.bf16 %v751_v13, %v751_v13  ;;  %v740_v19 = vsel %vm676_vm3, %v644_v58, %v708_v9  ;;  %vm674_vm5 = vcmp.ge.f32.partialorder %v642_v11, 0.0  ;;  %v706_v25 = vmul.f32 0.2, %v642_v11 }
 0x151   : > { %v756_v21 = vsel %vm692_vm4, %v660_v59, %v724_v10  ;;  %v1096_v23 = vpack.c.bf16 %v740_v19, %v740_v19  ;;  %v658_v26 = vadd.f32 %v1561_v22, %v619_v14  ;;  %v645_v27 = vadd.f32 %v1561_v22, %v606_v15 }
 0x152   : > { %v1112_v24 = vpack.c.bf16 %v756_v21, %v756_v21  ;;  %912 = vst.msk [vmem:[%s1579_s19 + $0x54] sm:$0xf] %vm890_vm1, %v1107_v18  ;;  %v661_v28 = vadd.f32 %v1561_v22, %v622_v16  ;;  %v604_v29 = vmul.f32 %v1553_v20, %v1613_v42  ;;  %v620_v30 = vmul.f32 %v1553_v20, %v1615_v43 }
 0x153   : > { %901 = vst.msk [vmem:[%s1579_s19 + $0x28] sm:$0xf] %vm890_vm1, %v1096_v23  ;;  %v738_v31 = vsel %vm674_vm5, %v642_v11, %v706_v25  ;;  %vm690_vm6 = vcmp.ge.f32.partialorder %v658_v26, 0.0  ;;  %v722_v32 = vmul.f32 0.2, %v658_v26  ;;  %v609_v33 = vmul.f32 %v1160_v61, %v1553_v20 }
 0x154   : > { %917 = vst.msk [vmem:[%s1579_s19 + $0x68] sm:$0xf] %vm890_vm1, %v1112_v24  ;;  %v1094_v34 = vpack.c.bf16 %v738_v31, %v738_v31  ;;  %vm677_vm7 = vcmp.ge.f32.partialorder %v645_v27, 0.0  ;;  %v709_v35 = vmul.f32 0.2, %v645_v27  ;;  %vm693_vm8 = vcmp.ge.f32.partialorder %v661_v28, 0.0 }
 0x155   : > { %v754_v36 = vsel %vm690_vm6, %v658_v26, %v722_v32  ;;  %v725_v37 = vmul.f32 0.2, %v661_v28  ;;  %v643_v38 = vadd.f32 %v1561_v22, %v604_v29  ;;  %v659_v39 = vadd.f32 %v1561_v22, %v620_v30 }
 0x156   : > { %899 = vst.msk [vmem:[%s1579_s19 + $0x20] sm:$0xf] %vm890_vm1, %v1094_v34  ;;  %v1110_v40 = vpack.c.bf16 %v754_v36, %v754_v36  ;;  %v741_v41 = vsel %vm677_vm7, %v645_v27, %v709_v35  ;;  %v648_v42 = vadd.f32 %v1561_v22, %v609_v33  ;;  %v625_v43 = vmul.f32 %v1176_v62, %v1553_v20 }
 0x157   : > { %v1097_v44 = vpack.c.bf16 %v741_v41, %v741_v41  ;;  %v757_v45 = vsel %vm693_vm8, %v661_v28, %v725_v37  ;;  %vm675_vm9 = vcmp.ge.f32.partialorder %v643_v38, 0.0  ;;  %v707_v46 = vmul.f32 0.2, %v643_v38 }
 0x158   : > { %915 = vst.msk [vmem:[%s1579_s19 + $0x60] sm:$0xf] %vm890_vm1, %v1110_v40  ;;  %v1113_v47 = vpack.c.bf16 %v757_v45, %v757_v45  ;;  %vm691_vm10 = vcmp.ge.f32.partialorder %v659_v39, 0.0  ;;  %v723_v48 = vmul.f32 0.2, %v659_v39  ;;  %vm680_vm11 = vcmp.ge.f32.partialorder %v648_v42, 0.0 }
 0x159   : > { %902 = vst.msk [vmem:[%s1579_s19 + $0x2c] sm:$0xf] %vm890_vm1, %v1097_v44  ;;  %v739_v49 = vsel %vm675_vm9, %v643_v38, %v707_v46  ;;  %v712_v50 = vmul.f32 0.2, %v648_v42  ;;  %v664_v51 = vadd.f32 %v1561_v22, %v625_v43  ;;  %v607_v52 = vmul.f32 %v1553_v20, %v1635_v2 }
 0x15a   : > { %918 = vst.msk [vmem:[%s1579_s19 + $0x6c] sm:$0xf] %vm890_vm1, %v1113_v47  ;;  %v1095_v53 = vpack.c.bf16 %v739_v49, %v739_v49  ;;  %v755_v54 = vsel %vm691_vm10, %v659_v39, %v723_v48  ;;  %v623_v55 = vmul.f32 %v1553_v20, %v1637_v3  ;;  %v610_v56 = vmul.f32 %v1639_v7, %v1553_v20 }
 0x15b   : > { %v1111_v57 = vpack.c.bf16 %v755_v54, %v755_v54  ;;  %v744_v58 = vsel %vm680_vm11, %v648_v42, %v712_v50  ;;  %vm696_vm12 = vcmp.ge.f32.partialorder %v664_v51, 0.0  ;;  %v728_v59 = vmul.f32 0.2, %v664_v51 }
 0x15c   : > { %900 = vst.msk [vmem:[%s1579_s19 + $0x24] sm:$0xf] %vm890_vm1, %v1095_v53  ;;  %v1100_v60 = vpack.c.bf16 %v744_v58, %v744_v58  ;;  %v646_v61 = vadd.f32 %v1561_v22, %v607_v52  ;;  %v662_v62 = vadd.f32 %v1561_v22, %v623_v55  ;;  %v649_v63 = vadd.f32 %v1561_v22, %v610_v56 }
 0x15d   : > { %916 = vst.msk [vmem:[%s1579_s19 + $0x64] sm:$0xf] %vm890_vm1, %v1111_v57  ;;  %v760_v0 = vsel %vm696_vm12, %v664_v51, %v728_v59  ;;  %v626_v1 = vmul.f32 %v1641_v8, %v1553_v20  ;;  %v608_v2 = vmul.f32 %v1553_v20, %v1646_v12  ;;  %v624_v3 = vmul.f32 %v1553_v20, %v1656_v17 }
 0x15e   : > { %905 = vst.msk [vmem:[%s1579_s19 + $0x38] sm:$0xf] %vm890_vm1, %v1100_v60  ;;  %v1116_v4 = vpack.c.bf16 %v760_v0, %v760_v0  ;;  %vm678_vm13 = vcmp.ge.f32.partialorder %v646_v61, 0.0  ;;  %v710_v5 = vmul.f32 0.2, %v646_v61  ;;  %vm694_vm14 = vcmp.ge.f32.partialorder %v662_v62, 0.0 }
 0x15f   : > { %v726_v6 = vmul.f32 0.2, %v662_v62  ;;  %vm681_vm15 = vcmp.ge.f32.partialorder %v649_v63, 0.0  ;;  %v713_v7 = vmul.f32 0.2, %v649_v63  ;;  %v665_v9 = vadd.f32 %v1561_v22, %v626_v1 }
 0x160   : > { %921 = vst.msk [vmem:[%s1579_s19 + $0x78] sm:$0xf] %vm890_vm1, %v1116_v4  ;;  %v742_v8 = vsel %vm678_vm13, %v646_v61, %v710_v5  ;;  %v647_v10 = vadd.f32 %v1561_v22, %v608_v2  ;;  %v663_v20 = vadd.f32 %v1561_v22, %v624_v3 }
 0x161   : > { %v1098_v11 = vpack.c.bf16 %v742_v8, %v742_v8  ;;  %v758_v12 = vsel %vm694_vm14, %v662_v62, %v726_v6  ;;  %v745_v13 = vsel %vm681_vm15, %v649_v63, %v713_v7  ;;  %vm697_vm0 = vcmp.ge.f32.partialorder %v665_v9, 0.0 }
 0x162   : > { %v1114_v14 = vpack.c.bf16 %v758_v12, %v758_v12  ;;  %v1101_v15 = vpack.c.bf16 %v745_v13, %v745_v13  ;;  %v729_v16 = vmul.f32 0.2, %v665_v9  ;;  %vm679_vm2 = vcmp.ge.f32.partialorder %v647_v10, 0.0 }
 0x163   : > { %903 = vst.msk [vmem:[%s1579_s19 + $0x30] sm:$0xf] %vm890_vm1, %v1098_v11  ;;  %v711_v17 = vmul.f32 0.2, %v647_v10  ;;  %vm695_vm3 = vcmp.ge.f32.partialorder %v663_v20, 0.0 }
 0x164   : > { %v727_v18 = vmul.f32 0.2, %v663_v20  ;;  %919 = vst.msk [vmem:[%s1579_s19 + $0x70] sm:$0xf] %vm890_vm1, %v1114_v14  ;;  %906 = vst.msk [vmem:[%s1579_s19 + $0x3c] sm:$0xf] %vm890_vm1, %v1101_v15  ;;  %v761_v22 = vsel %vm697_vm0, %v665_v9, %v729_v16 }
 0x165   : > { %v1117_v19 = vpack.c.bf16 %v761_v22, %v761_v22  ;;  %v743_v21 = vsel %vm679_vm2, %v647_v10, %v711_v17 }
 0x166   : > { %v759_v23 = vsel %vm695_vm3, %v663_v20, %v727_v18  ;;  %v1099_v24 = vpack.c.bf16 %v743_v21, %v743_v21 }
 0x167   : > { %v1115_v25 = vpack.c.bf16 %v759_v23, %v759_v23  ;;  %922 = vst.msk [vmem:[%s1579_s19 + $0x7c] sm:$0xf] %vm890_vm1, %v1117_v19 }
 0x168   : > { %904 = vst.msk [vmem:[%s1579_s19 + $0x34] sm:$0xf] %vm890_vm1, %v1099_v24 }
 0x169   : > { %920 = vst.msk [vmem:[%s1579_s19 + $0x74] sm:$0xf] %vm890_vm1, %v1115_v25 }
 0x16a PF: > { %p15_p1 = scmp.ge.s32.totalorder %s1429_s25, 4   ;;  %s1753_s15 = smov %s1346_s16 }
 0x16b   : > { %s1754_s16 = smov %s1350_s17  ;;  %s1755_s17 = smov %s1458_s14 }
 0x16c   : > { %s1756_s18 = smov %s1429_s25  ;;  %17 = sbr.rel (!%p15_p1) target bundleno = 4 (0x4), region = 80 }
 0x173   :  { %944 = vsyncpa [#allocation3], 1 }
 0x174   :  { %946 = vsyncpa [#allocation3 + $0x1], 1 }
 0x175   :  { %947 = vsyncpa [#allocation5], 1 }

</bundles_post_ra>
